<compile_context>
chip_gen: v7x
topology: tpu7x:2x2x1
jax: 0.10.0
libtpu: 0.0.40
codegen_flags: <defaults>
</compile_context>

<pallas_src>
import jax
import jax.numpy as jnp
from jax.experimental import pallas as pl
from jax.experimental.pallas import tpu as pltpu


def _round_up(x, m):
    return (x + m - 1) // m * m


def _vmem_capacity_bytes():
    # Generation-aware sizing; fall back to the smallest generation's VMEM
    # (v7x, 64 MiB) so the sizing stays safe if the query is unavailable.
    try:
        return int(pltpu.get_tpu_info().vmem_capacity_bytes)
    except Exception:
        return 64 << 20


def _make_attention_kernel(masked):
    def kernel(*refs):
        if masked:
            x_ref, w_ref, b_ref, m_ref, out_ref, wts_ref = refs
        else:
            x_ref, w_ref, b_ref, out_ref, wts_ref = refs

        x = x_ref[...].astype(jnp.float32)            # (Bt, T, H)
        w = w_ref[...].astype(jnp.float32)            # (1, H)
        bias = b_ref[0]                               # scalar (SMEM)

        # scores = Linear(H -> 1)(x): VPU multiply + lane reduce over H
        # (avoids a degenerate N=1 MXU matmul; VPU/XLU slots are free here).
        scores = jnp.sum(x * w[None, :, :], axis=-1) + bias      # (Bt, T)

        if masked:
            scores = jnp.where(m_ref[...] == 0, jnp.float32(-1e9), scores)

        # Softmax over the sequence axis (T = lane axis).
        s_max = jnp.max(scores, axis=-1, keepdims=True)          # (Bt, 1)
        e = jnp.exp(scores - s_max)                              # (Bt, T)
        denom = jnp.sum(e, axis=-1, keepdims=True)               # (Bt, 1)
        # Exact division to stay within 1e-5 of the reference.
        weights = e / denom                                      # (Bt, T)
        wts_ref[...] = weights.astype(wts_ref.dtype)

        # output[b, h] = sum_t x[b, t, h] * weights[b, t]
        out = jnp.sum(x * weights[:, :, None], axis=1)           # (Bt, H)
        out_ref[...] = out.astype(out_ref.dtype)

    return kernel


def attention_forward(inputs, weight, bias, mask=None, block_b=None):
    """inputs: (B, T, H); weight: (1, H) [nn.Linear(H,1).weight]; bias: (1,).
    Returns (output (B, H), weights (B, T)) — same semantics as the PyTorch
    module's forward (weights emitted in f32)."""
    B, T, H = inputs.shape
    dtype = inputs.dtype
    itemsize = jnp.dtype(dtype).itemsize

    vmem_cap = _vmem_capacity_bytes()
    big_vmem = vmem_cap >= (96 << 20)            # v5e/v6e (128 MiB) vs v7x (64 MiB)

    row_native = T * H * itemsize                # HBM bytes of x per batch row
    row_f32 = T * H * 4
    # On-chip cost per row: double-buffered native input + ~3 block-sized f32
    # intermediates (x.astype(f32), x*w, x*weights) + small per-row slabs
    # (out, wts, mask, all double-buffered).
    row_cost = 2 * row_native + 3 * row_f32 + 2 * (H * itemsize + T * 4 + T * itemsize)

    if block_b is None:
        x_target = (8 << 20) if big_vmem else (3 << 20)   # native x bytes / step
        vmem_budget = int((0.70 if big_vmem else 0.60) * vmem_cap)
        block_b = min(x_target // max(1, row_native),
                      vmem_budget // max(1, row_cost))
        block_b = max(8, (block_b // 8) * 8)

    if B <= block_b:
        block_b = B                   # single full block: no padding, full-dim blocks
    else:
        # >= 2 balanced grid steps so the "parallel" batch axis shards across
        # both TensorCores on v7x; keep the block a multiple of 8 rows.
        block_b = max(8, (min(block_b, _round_up(pl.cdiv(B, 2), 8)) // 8) * 8)

    grid = (pl.cdiv(B, block_b),)     # ragged last block handled by Pallas

    w_row = weight.reshape(1, H)                    # native dtype; cast in-kernel
    b_arr = bias.reshape(1).astype(jnp.float32)     # scalar -> SMEM

    # VMEM limit from the real footprint, capped per generation.
    footprint = block_b * row_cost + 2 * H * itemsize + 4096
    hard_cap = min(vmem_cap - (16 << 20), 100 << 20)     # ~48 MiB v7x, ~100 MiB v5e/v6e
    vmem_limit = int(min(max(footprint + (8 << 20), 32 << 20), hard_cap))

    in_specs = [
        pl.BlockSpec((block_b, T, H), lambda i: (i, 0, 0)),      # inputs
        pl.BlockSpec((1, H), lambda i: (0, 0)),                  # weight row
        pl.BlockSpec(memory_space=pltpu.MemorySpace.SMEM),       # bias scalar
    ]
    args = [inputs, w_row, b_arr]
    if mask is not None:
        # Mask in the input dtype (0.0 / 1.0); no mask traffic at all when None.
        mask_nd = (mask.reshape(B, T) != 0).astype(dtype)
        in_specs.append(pl.BlockSpec((block_b, T), lambda i: (i, 0)))
        args.append(mask_nd)

    out, wts = pl.pallas_call(
        _make_attention_kernel(mask is not None),
        out_shape=(
            jax.ShapeDtypeStruct((B, H), dtype),         # attended output
            jax.ShapeDtypeStruct((B, T), jnp.float32),   # attention weights
        ),
        grid_spec=pltpu.PrefetchScalarGridSpec(
            num_scalar_prefetch=0,
            grid=grid,
            in_specs=in_specs,
            out_specs=[
                pl.BlockSpec((block_b, H), lambda i: (i, 0)),    # output
                pl.BlockSpec((block_b, T), lambda i: (i, 0)),    # weights
            ],
        ),
        compiler_params=pltpu.CompilerParams(
            dimension_semantics=("parallel",),
            vmem_limit_bytes=vmem_limit,
        ),
    )(*args)

    return out, wts


def attention_reference(inputs, weight, bias, mask=None):
    # Pure-JAX reference mirroring the PyTorch forward.
    scores = jnp.einsum("bth,oh->bto", inputs, weight) + bias   # (B, T, 1)
    scores = scores[..., 0]                                     # (B, T)
    if mask is not None:
        scores = jnp.where(mask == 0, -1e9, scores)
    weights = jax.nn.softmax(scores, axis=-1)                   # (B, T)
    output = jnp.einsum("bth,bt->bh", inputs, weights)          # (B, H)
    return output, weights


if __name__ == "__main__":
    B, T, H = 2, 8, 32  # batch, seq_len, hidden_size

    key = jax.random.PRNGKey(0)
    k_x, k_w, k_b, k_m, k_x2, k_m2 = jax.random.split(key, 6)

    # Deterministic init (nn.Linear(hidden_size, 1): weight (1, H), bias (1,))
    inputs = jax.random.normal(k_x, (B, T, H), dtype=jnp.float32)
    weight = jax.random.normal(k_w, (1, H), dtype=jnp.float32) * 0.1
    bias = jax.random.normal(k_b, (1,), dtype=jnp.float32) * 0.1
    mask = (jax.random.uniform(k_m, (B, T)) > 0.3).astype(jnp.float32)
    mask = mask.at[:, 0].set(1.0)  # guarantee at least one valid position

    # mask=None path (dedicated no-mask kernel variant)
    out0, wts0 = attention_forward(inputs, weight, bias, mask=None)
    jax.block_until_ready((out0, wts0))
    ref_out0, ref_wts0 = attention_reference(inputs, weight, bias, mask=None)
    assert jnp.allclose(out0, ref_out0, atol=1e-5), "output mismatch (no mask)"
    assert jnp.allclose(wts0, ref_wts0, atol=1e-5), "weights mismatch (no mask)"

    # masked path
    out1, wts1 = attention_forward(inputs, weight, bias, mask=mask)
    jax.block_until_ready((out1, wts1))
    ref_out1, ref_wts1 = attention_reference(inputs, weight, bias, mask=mask)
    assert jnp.allclose(out1, ref_out1, atol=1e-5), "output mismatch (masked)"
    assert jnp.allclose(wts1, ref_wts1, atol=1e-5), "weights mismatch (masked)"

    # Multi-block path with a ragged last block (B % block_b != 0, no padding).
    B2 = 20
    inputs2 = jax.random.normal(k_x2, (B2, T, H), dtype=jnp.float32)
    mask2 = (jax.random.uniform(k_m2, (B2, T)) > 0.3).astype(jnp.float32)
    mask2 = mask2.at[:, 0].set(1.0)

    out2, wts2 = attention_forward(inputs2, weight, bias, mask=None, block_b=8)
    jax.block_until_ready((out2, wts2))
    ref_out2, ref_wts2 = attention_reference(inputs2, weight, bias, mask=None)
    assert jnp.allclose(out2, ref_out2, atol=1e-5), "output mismatch (ragged, no mask)"
    assert jnp.allclose(wts2, ref_wts2, atol=1e-5), "weights mismatch (ragged, no mask)"

    out3, wts3 = attention_forward(inputs2, weight, bias, mask=mask2, block_b=8)
    jax.block_until_ready((out3, wts3))
    ref_out3, ref_wts3 = attention_reference(inputs2, weight, bias, mask=mask2)
    assert jnp.allclose(out3, ref_out3, atol=1e-5), "output mismatch (ragged, masked)"
    assert jnp.allclose(wts3, ref_wts3, atol=1e-5), "weights mismatch (ragged, masked)"

    print("KERNEL_OK")
</pallas_src>

<mosaic_0001>
module attributes {stable_mosaic.version = 11 : i64} {
  func.func @kernel(%arg0: i32, %arg1: memref<2x8x32xf32, #tpu.memory_space<vmem>>, %arg2: memref<1x32xf32, #tpu.memory_space<vmem>>, %arg3: memref<1xf32, #tpu.memory_space<smem>>, %arg4: memref<2x32xf32, #tpu.memory_space<vmem>>, %arg5: memref<2x8xf32, #tpu.memory_space<vmem>>) attributes {dimension_semantics = [#tpu.dimension_semantics<parallel>], iteration_bounds = array<i64: 1>, scalar_prefetch = 0 : i64, scratch_operands = 0 : i64, tpu.core_type = #tpu.core_type<tc>, window_params = [{transform_indices = @transform_0, window_bounds = array<i64: 2, 8, 32>}, {pipeline_mode = #tpu.pipeline_mode<synchronous>, transform_indices = @transform_1, window_bounds = array<i64: 1, 32>}, {transform_indices = @transform_2, window_bounds = array<i64: 1>}, {transform_indices = @transform_3, window_bounds = array<i64: 2, 32>}, {transform_indices = @transform_4, window_bounds = array<i64: 2, 8>}]} {
    %c0 = arith.constant 0 : index
    %c0_0 = arith.constant 0 : index
    %c0_1 = arith.constant 0 : index
    %0 = vector.load %arg1[%c0, %c0_0, %c0_1] : memref<2x8x32xf32, #tpu.memory_space<vmem>>, vector<2x8x32xf32>
    %c0_2 = arith.constant 0 : index
    %c0_3 = arith.constant 0 : index
    %1 = vector.load %arg2[%c0_2, %c0_3] : memref<1x32xf32, #tpu.memory_space<vmem>>, vector<1x32xf32>
    %c0_4 = arith.constant 0 : index
    %2 = memref.load %arg3[%c0_4] : memref<1xf32, #tpu.memory_space<smem>>
    %3 = vector.shape_cast %1 : vector<1x32xf32> to vector<1x1x32xf32>
    %4 = vector.broadcast %3 : vector<1x1x32xf32> to vector<2x8x32xf32>
    %5 = arith.mulf %0, %4 : vector<2x8x32xf32>
    %cst = arith.constant dense<0.000000e+00> : vector<2x8xf32>
    %6 = vector.multi_reduction <add>, %5, %cst [2] : vector<2x8x32xf32> to vector<2x8xf32>
    %7 = vector.broadcast %2 : f32 to vector<2x8xf32>
    %8 = arith.addf %6, %7 : vector<2x8xf32>
    %cst_5 = arith.constant dense<0xFF800000> : vector<2xf32>
    %9 = vector.multi_reduction <maximumf>, %8, %cst_5 [1] : vector<2x8xf32> to vector<2xf32>
    %10 = vector.shape_cast %9 : vector<2xf32> to vector<2x1xf32>
    %11 = vector.broadcast %10 : vector<2x1xf32> to vector<2x8xf32>
    %12 = arith.subf %8, %11 : vector<2x8xf32>
    %13 = math.exp %12 : vector<2x8xf32>
    %cst_6 = arith.constant dense<0.000000e+00> : vector<2xf32>
    %14 = vector.multi_reduction <add>, %13, %cst_6 [1] : vector<2x8xf32> to vector<2xf32>
    %15 = vector.shape_cast %14 : vector<2xf32> to vector<2x1xf32>
    %16 = vector.broadcast %15 : vector<2x1xf32> to vector<2x8xf32>
    %17 = arith.divf %13, %16 : vector<2x8xf32>
    %c0_7 = arith.constant 0 : index
    %c0_8 = arith.constant 0 : index
    %18 = vector.load %arg5[%c0_7, %c0_8] : memref<2x8xf32, #tpu.memory_space<vmem>>, vector<2x8xf32>
    tpu.vector_store %arg5[%c0_7, %c0_8], %17 {strides = array<i32>} : memref<2x8xf32, #tpu.memory_space<vmem>>, vector<2x8xf32>,
    %19 = vector.shape_cast %17 : vector<2x8xf32> to vector<2x8x1xf32>
    %20 = vector.broadcast %19 : vector<2x8x1xf32> to vector<2x8x32xf32>
    %21 = arith.mulf %0, %20 : vector<2x8x32xf32>
    %cst_9 = arith.constant dense<0.000000e+00> : vector<2x32xf32>
    %22 = vector.multi_reduction <add>, %21, %cst_9 [1] : vector<2x8x32xf32> to vector<2x32xf32>
    %c0_10 = arith.constant 0 : index
    %c0_11 = arith.constant 0 : index
    %23 = vector.load %arg4[%c0_10, %c0_11] : memref<2x32xf32, #tpu.memory_space<vmem>>, vector<2x32xf32>
    tpu.vector_store %arg4[%c0_10, %c0_11], %22 {strides = array<i32>} : memref<2x32xf32, #tpu.memory_space<vmem>>, vector<2x32xf32>,
    return
  }
  func.func @transform_0(%arg0: i32) -> (i32, i32, i32) {
    %c0_i32 = arith.constant 0 : i32
    %c0_i32_0 = arith.constant 0 : i32
    %c0_i32_1 = arith.constant 0 : i32
    return %arg0, %c0_i32, %c0_i32_0 : i32, i32, i32
  }
  func.func @transform_1(%arg0: i32) -> (i32, i32) {
    %c0_i32 = arith.constant 0 : i32
    %c0_i32_0 = arith.constant 0 : i32
    %c0_i32_1 = arith.constant 0 : i32
    return %c0_i32, %c0_i32_0 : i32, i32
  }
  func.func @transform_2(%arg0: i32) -> i32 {
    %c0_i32 = arith.constant 0 : i32
    %c0_i32_0 = arith.constant 0 : i32
    return %c0_i32 : i32
  }
  func.func @transform_3(%arg0: i32) -> (i32, i32) {
    %c0_i32 = arith.constant 0 : i32
    %c0_i32_0 = arith.constant 0 : i32
    return %arg0, %c0_i32 : i32, i32
  }
  func.func @transform_4(%arg0: i32) -> (i32, i32) {
    %c0_i32 = arith.constant 0 : i32
    %c0_i32_0 = arith.constant 0 : i32
    return %arg0, %c0_i32 : i32, i32
  }
}

</mosaic_0001>

<bundles_post_ra>
// kernel: tpu_custom_call.1
= control target key start
LH: loop header
LB: loop body
LE: loop exit
PB: predicated region body
PF: predicated region fallthrough
CT: control target
= control target key end

     0   :  { %11 = vsyncpa [#allocation4], 0  ;;  %s380_s0 = inlined_call_operand.hbm [shape: f32[2,8,32], index: 0, kind: input, shape index: {}]   ;;  %s381_s1 = inlined_call_operand.vmem [shape: f32[1,32], index: 1, kind: input, shape index: {}]   ;;  %s382_s2 = inlined_call_operand.<no memory space> [shape: f32[1], index: 2, kind: input, shape index: {}]   ;;  %s383_s3 = inlined_call_operand.hbm [shape: f32[2,32], index: 3, kind: output, shape index: {0}]   ;;  %s384_s4 = inlined_call_operand.hbm [shape: f32[2,8], index: 4, kind: output, shape index: {1}]  }
   0x1   :  { %12 = vsyncpa [#allocation5], 0 }
   0x2   :  { %13 = vsyncpa [#allocation8], 0  ;;  %s288_s15 = smov [#allocation3]   ;;  %s216_s19 = scalar_lea.hbm %s380_s0, 256 }
   0x3   :  { %s19_s16 = sshll.u32 %s288_s15, 4  ;;  %p217_p0 = scmp.ne.s32.totalorder %s380_s0, %s216_s19  ;;  %s20_s16 = int_to_ptr.vmem [resolvable:$true] %s19_s16 }
   0x4   :  { %p220_p1 = scmp.lt.u32.totalorder %s216_s19, %s380_s0 }
   0x6   :  { %p222_p2 = pnand %p220_p1, %p217_p0 }
   0x8   :  { %225 = shalt.err (!%p222_p2)
}
   0x9   :  { %s226_s24 = scalar_lea.vmem %s20_s16, 256  ;;  %p231_p4 = scmp.lt.s32.totalorder %s20_s16, %s20_s16 }
   0xa   :  { %p227_p3 = scmp.ne.s32.totalorder %s20_s16, %s226_s24  ;;  %p232_p5 = scmp.lt.s32.totalorder %s226_s24, %s226_s24 }
   0xc   :  { %p233_p6 = por %p232_p5, %p231_p4 }
   0xe   :  { %p234_p7 = pnand %p233_p6, %p227_p3 }
  0x10   :  { %237 = shalt.err (!%p234_p7)
}
  0x11   :  { %s289_s25 = smov 128   ;;  %s290_s26 = smov 8  }
  0x12   :  { %25 = dma.hbm_to_vmem [thread:$0]  %s380_s0, 256, %s20_s16, [#allocation4], %s289_s25, %s289_s25, %s290_s26  }
  0x13   :  { %282 = dma.done.wait [#allocation4], 256  }
  0x14   :  { %283 = vsyncadd [#allocation4], 4294967040  ;;  %v331_v0 = vld [vmem:[#allocation3] sm:$0xff]  ;;  %vm45_vm0 = vcmask 261120   ;;  %v336_v2 = vld [vmem:[#allocation3 + $0x8] sm:$0xff]  ;;  %v57_v7 = vlaneseq  ;;  %v52_v10 = vstv %s382_s2  ;;  %vm67_vm1 = vcmask 1041409  }
  0x15   :  { %v199_v1 = vld [vmem:[%s381_s1] ss:$0 sm:$0xff]  ;;  %vm70_vm2 = vcmask 58368   ;;  %v291_v20 = vmov 0   ;;  %s292_s1 = smov [#allocation7]  }
  0x16   :  { %v43_v3 = vmul.f32 %v199_v1, %v331_v0  ;;  %v44_v4 = vmul.f32 %v199_v1, %v336_v2  ;;  %v58_v8 = vand.u32 127, %v57_v7  ;;  %v60_v9 = vshrl.u32 %v57_v7, 7  ;;  %207 = vset.pattern.permute.xlu0 %v291_v20  ;;  %206 = vset.pattern.permute.xlu1 %v291_v20  ;;  %s186_s2 = sshll.u32 %s292_s1, 4  ;;  %s187_s2 = int_to_ptr.vmem [resolvable:$true] %s186_s2 }
  0x17   :  { %s238_s6 = scalar_lea.vmem %s187_s2, 32  ;;  %p243_p9 = scmp.lt.s32.totalorder %s187_s2, %s187_s2 }
  0x18   :  { %v46_v5 = vsel %vm45_vm0, %v43_v3, 0.0  ;;  %v49_v6 = vsel %vm45_vm0, %v44_v4, 0.0  ;;  %v61_v12 = vsub.s32 %v58_v8, %v60_v9  ;;  %v77_v21 = vsub.s32 0, %v60_v9  ;;  %p239_p8 = scmp.ne.s32.totalorder %s187_s2, %s238_s6  ;;  %p244_p10 = scmp.lt.s32.totalorder %s238_s6, %s238_s6 }
  0x19   :  { %47 = vadd.xlane.f32.xlu0 %v46_v5  ;;  %v81_v22 = vsub.s32 1, %v60_v9 }
  0x1a   :  { %p245_p11 = por %p244_p10, %p243_p9 }
  0x1c   :  { %p246_p12 = pnand %p245_p11, %p239_p8 }
  0x1d   :  { %50 = vadd.xlane.f32.xlu0 %v49_v6 }
  0xa6   :  { %v48_v11 = vpop.xlane.xlu0 %47 }
  0xa7   :  { %v53_v13 = vadd.f32 %v52_v10, %v48_v11 }
  0xa9   :  { %v62_v16 = vrot.slane %v53_v13, %v61_v12 }
  0xaa   :  { %v51_v14 = vpop.xlane.xlu0 %50 }
  0xab   :  { %v54_v15 = vadd.f32 %v52_v10, %v51_v14 }
  0xad   :  { %v66_v17 = vrot.slane %v54_v15, %v61_v12 }
  0xaf   :  { %v68_v18 = vsel %vm67_vm1, %v66_v17, %v62_v16 }
  0xb0   :  { %v71_v19 = vsel %vm70_vm2, %v68_v18, -inf }
  0xb1   :  { %72 = vmax.xlane.f32.xlu1 %v71_v19 }
 0x13e   :  { %v73_v23 = vpop.xlane.xlu1 %72 }
 0x13f   :  { %v78_v24 = vrot.slane %v73_v23, %v77_v21  ;;  %v82_v25 = vrot.slane %v73_v23, %v81_v22 }
 0x141   :  { %v85_v26 = vsub.f32 %v53_v13, %v78_v24  ;;  %v86_v27 = vsub.f32 %v54_v15, %v82_v25 }
 0x143   :  { %v87_v28 = vmul.f32 1.442695, %v85_v26  ;;  %v89_v29 = vmul.f32 1.442695, %v86_v27 }
 0x145   :  { %208 = vpow2.f32 %v87_v28 }
 0x146   :  { %210 = vpow2.f32 %v89_v29 }
 0x14f   :  { %v209_v30 = vpop.eup %208 }
 0x150   :  { %v211_v31 = vpop.eup %210  ;;  %94 = vperm.xlu1 %206, %v209_v30  }
 0x151   :  { %97 = vperm.xlu0 %207, %v211_v31  }
 0x1cf   :  { %v95_v32 = vpop.permute.xlu1 %94 }
 0x1d0   :  { %v98_v33 = vpop.permute.xlu0 %97  ;;  %v102_v34 = vrot.slane %v95_v32, %v61_v12 }
 0x1d1   :  { %v106_v35 = vrot.slane %v98_v33, %v61_v12 }
 0x1d3   :  { %v107_v36 = vsel %vm67_vm1, %v106_v35, %v102_v34 }
 0x1d4   :  { %v109_v37 = vsel %vm70_vm2, %v107_v36, 0.0 }
 0x1d5   :  { %110 = vadd.xlane.f32.xlu1 %v109_v37 }
 0x262   :  { %v111_v38 = vpop.xlane.xlu1 %110 }
 0x263   :  { %v116_v39 = vrot.slane %v111_v38, %v77_v21  ;;  %v120_v40 = vrot.slane %v111_v38, %v81_v22 }
 0x265   :  { %212 = vrcp.f32 %v116_v39 }
 0x266   :  { %214 = vrcp.f32 %v120_v40 }
 0x26f   :  { %v213_v41 = vpop.eup %212 }
 0x270   :  { %v124_v42 = vmul.f32 %v213_v41, %v209_v30  ;;  %v215_v43 = vpop.eup %214 }
 0x271   :  { %v126_v44 = vmul.f32 %v215_v43, %v211_v31 }
 0x272   :  { %130 = vperm.xlu0 %207, %v124_v42  }
 0x276   :  { %133 = vperm.xlu0 %207, %v126_v44  }
 0x2f1   :  { %v131_v45 = vpop.permute.xlu0 %130 }
 0x2f2   :  { %v148_v46 = vmul.f32 %v131_v45, %v331_v0  ;;  %v138_v50 = vrot.slane %v131_v45, %v61_v12 }
 0x2f4   :  { %v150_v47 = vsel %vm45_vm0, %v148_v46, 0.0 }
 0x2f5   :  { %v151_v48 = vrot.slane %v150_v47, 4  ;;  %v134_v49 = vpop.permute.xlu0 %133 }
 0x2f6   :  { %v142_v51 = vrot.slane %v134_v49, %v61_v12  ;;  %v149_v52 = vmul.f32 %v134_v49, %v336_v2 }
 0x2f7   :  { %v152_v53 = vadd.f32 %v151_v48, %v150_v47 }
 0x2f8   :  { %v157_v54 = vsel %vm45_vm0, %v149_v52, 0.0  ;;  %v143_v55 = vsel %vm67_vm1, %v142_v51, %v138_v50 }
 0x2f9   :  { %v153_v56 = vrot.slane %v152_v53, 2  ;;  %v158_v57 = vrot.slane %v157_v54, 4  ;;  %145 = vst.msk [vmem:[#allocation7] sm:$0x3] %vm70_vm2, %v143_v55 }
 0x2fa   :  { %249 = shalt.err (!%p246_p12)
}
 0x2fb   :  { %s250_s9 = scalar_lea.hbm %s384_s4, 32 }
 0x2fc   :  { %p251_p13 = scmp.ne.s32.totalorder %s384_s4, %s250_s9  ;;  %p254_p0 = scmp.lt.u32.totalorder %s250_s9, %s384_s4 }
 0x2fe   :  { %p256_p1 = pnand %p254_p0, %p251_p13 }
 0x300   :  { %259 = shalt.err (!%p256_p1)
}
 0x301   :  { %189 = dma.vmem_to_hbm [thread:$0]  %s187_s2, 32, %s384_s4, [#allocation8]   ;;  %v154_v58 = vadd.f32 %v153_v56, %v152_v53  ;;  %v159_v59 = vadd.f32 %v158_v57, %v157_v54  ;;  %vm168_vm3 = vcmask 254976  }
 0x302   :  { %s293_s16 = smov [#allocation6]  }
 0x303   :  { %v160_v60 = vrot.slane %v159_v59, 2  ;;  %v155_v61 = vrot.slane %v154_v58, 1  ;;  %s176_s17 = sshll.u32 %s293_s16, 4  ;;  %s177_s17 = int_to_ptr.vmem [resolvable:$true] %s176_s17 }
 0x304   :  { %s260_s18 = scalar_lea.vmem %s177_s17, 32  ;;  %p265_p3 = scmp.lt.s32.totalorder %s177_s17, %s177_s17 }
 0x305   :  { %v161_v62 = vadd.f32 %v160_v60, %v159_v59  ;;  %v156_v1 = vadd.f32 %v155_v61, %v154_v58  ;;  %p261_p2 = scmp.ne.s32.totalorder %s177_s17, %s260_s18  ;;  %p266_p4 = scmp.lt.s32.totalorder %s260_s18, %s260_s18 }
 0x307   :  { %v162_v63 = vrot.slane %v161_v62, 1  ;;  %p267_p5 = por %p266_p4, %p265_p3 }
 0x309   :  { %v163_v0 = vadd.f32 %v162_v63, %v161_v62  ;;  %p268_p6 = pnand %p267_p5, %p261_p2 }
 0x30b   :  { %v166_v2 = vsel %vm67_vm1, %v163_v0, %v156_v1 }
 0x30c   :  { %169 = vst.msk [vmem:[#allocation6] sm:$0x3] %vm168_vm3, %v166_v2 }
 0x30d   :  { %271 = shalt.err (!%p268_p6)
}
 0x30e   :  { %s272_s20 = scalar_lea.hbm %s383_s3, 32 }
 0x30f   :  { %p273_p7 = scmp.ne.s32.totalorder %s383_s3, %s272_s20  ;;  %p276_p8 = scmp.lt.u32.totalorder %s272_s20, %s383_s3 }
 0x311   :  { %p278_p9 = pnand %p276_p8, %p273_p7 }
 0x313   :  { %281 = shalt.err (!%p278_p9)
}
 0x314   :  { %179 = dma.vmem_to_hbm [thread:$0]  %s177_s17, 32, %s383_s3, [#allocation5]  }
 0x315   :  { %284 = dma.done.wait [#allocation5], 32  }
 0x316   :  { %285 = vsyncadd [#allocation5], 4294967264 }
 0x317   :  { %286 = dma.done.wait [#allocation8], 32  }
 0x318   :  { %287 = vsyncadd [#allocation8], 4294967264 }
 0x319   :  { %196 = vsyncpa [#allocation4], 1 }
 0x31a   :  { %197 = vsyncpa [#allocation5], 1 }
 0x31b   :  { %198 = vsyncpa [#allocation8], 1 }

</bundles_post_ra>
